<compile_context>
chip_gen: v6e
topology: v6e:2x2x1
jax: 0.10.0
libtpu: 0.0.40
codegen_flags: <defaults>
</compile_context>

<pallas_src>
import math

import jax
import jax.numpy as jnp
import numpy as np
from jax import lax
from jax.experimental import pallas as pl
from jax.experimental.pallas import tpu as pltpu


def _make_posterior_kernel(T, B, C, Y):
    """One invocation runs the full T-step guided diffusion loop."""

    def kernel(img_ref, meas_ref, mask_ref, wcls_ref,
               ak_ref, ab_ref, pk_ref, pb_ref, vk_ref,
               out_ref):
        meas = meas_ref[...]            # (B, Y)   target measurement
        mask = mask_ref[...]            # (CB, CY) block-diagonal 0/1 constant

        def body(k, x):                 # x: packed image (CB, HW)
            a_k = ak_ref[k]             # (CB, CB)   x0   = a_k @ x + a_b
            a_b = ab_ref[k]             # (CB, 1)
            p_k = pk_ref[k]             # (CB, CB)   prev = p_k @ x + p_b
            p_b = pb_ref[k]             # (CB, 1)

            x0 = jnp.dot(a_k, x, preferred_element_type=jnp.float32) + a_b
            prev = jnp.dot(p_k, x, preferred_element_type=jnp.float32) + p_b

            # classifier forward: one lane-contraction (CB,HW)·(CY,HW)->(CB,CY)
            P = lax.dot_general(x0, wcls_ref[...], (((1,), (1,)), ((), ())),
                                preferred_element_type=jnp.float32)
            # block-diagonal fold (cheap in-vreg slices + adds, no MXU)
            pred = P[0:B, 0:Y]
            for c in range(1, C):
                pred = pred + P[c * B:(c + 1) * B, c * Y:(c + 1) * Y]   # (B, Y)

            # residual; the shared sb_t*noise term cancels exactly, and the
            # sa_t factors cancel against Ak^T (folded into Vk on the host)
            diff = meas - pred
            inv_norm = lax.rsqrt(jnp.maximum(jnp.sum(diff * diff), 1e-20))
            d2 = inv_norm * diff                                         # (B, Y)

            # block-diagonal embed (VPU) + single backward matmul against the
            # per-step weight Vk (scale, 1/sa_t and (I - sb_t*W^T) folded in)
            row = jnp.concatenate([d2] * C, axis=1)                      # (B, CY)
            d2bd = jnp.concatenate([row] * C, axis=0) * mask             # (CB, CY)
            guid = jnp.dot(d2bd, vk_ref[k],
                           preferred_element_type=jnp.float32)           # (CB, HW)
            return prev + guid

        out_ref[...] = lax.fori_loop(0, T, body, img_ref[...])

    return kernel


def _affine_kernel(img_ref, m_ref, b_ref, out_ref):
    # sample_from_prior fast path: the whole prior trajectory composed on the
    # host into a single affine map (review item 10).
    out_ref[...] = (jnp.dot(m_ref[...], img_ref[...],
                            preferred_element_type=jnp.float32) + b_ref[...])


def posterior_prior_baseline_sample(image_init, weps, beps, wcls,
                                    measurement, measurement_noise=None, *,
                                    traj_length=1000, sampling_length=8,
                                    scale=1.0, sample_from_prior=False):
    # measurement_noise is accepted for API parity only: scheduler.add_noise
    # adds the identical sqrt(1-abar_t)*noise term to both the measurement and
    # the prediction, so it cancels exactly in the residual.
    del measurement_noise

    B, C, H, W = image_init.shape
    HW = H * W
    Y = int(measurement.shape[-1])
    CB, CY = C * B, C * Y
    T = sampling_length
    f32 = np.float32

    # --- scheduler tables + fused per-step matrices (host numpy glue) --------
    betas = np.linspace(1e-4, 0.02, traj_length, dtype=np.float64)
    abar = np.cumprod(1.0 - betas)
    step = traj_length // sampling_length
    timesteps = np.arange(0, traj_length, step)[::-1].copy()   # descending

    Wnp = np.asarray(weps, dtype=np.float64)                     # (C, C)
    bnp = np.asarray(beps, dtype=np.float64)                     # (C,)
    Wcls3 = np.asarray(wcls, dtype=np.float64).reshape(Y, C, HW)  # (Y, C, HW)
    I_C = np.eye(C)
    I_B = np.eye(B)

    Ak = np.zeros((T, CB, CB), f32)
    ab = np.zeros((T, CB, 1), f32)
    Pk = np.zeros((T, CB, CB), f32)
    pb = np.zeros((T, CB, 1), f32)
    Vk = np.zeros((T, CY, HW), f32)
    for k, t in enumerate(timesteps):
        sa_t = math.sqrt(abar[t])
        sb_t = math.sqrt(1.0 - abar[t])
        tprev = t - step
        abar_p = abar[tprev] if tprev >= 0 else 1.0
        sa_p = math.sqrt(abar_p)
        sb_p = math.sqrt(1.0 - abar_p)
        tval = float(t) / float(traj_length)

        A_c = (I_C - sb_t * Wnp) / sa_t           # x0   = A_c-mix of channels
        a_c = -(sb_t * tval / sa_t) * bnp
        P_c = sa_p * A_c + sb_p * Wnp             # prev = P_c-mix of channels
        p_c = sa_p * a_c + sb_p * tval * bnp
        N_c = I_C - sb_t * Wnp.T                  # transposed eps-model mix

        Ak[k] = np.kron(A_c, I_B)
        Pk[k] = np.kron(P_c, I_B)
        ab[k, :, 0] = np.repeat(a_c, B)
        pb[k, :, 0] = np.repeat(p_c, B)
        # Vk[c*Y+y, i] = scale * sum_c' N_c[c,c'] * Wcls[y, c'*HW + i]
        Vk[k] = (float(scale)
                 * np.einsum('cd,ydi->cyi', N_c, Wcls3)).reshape(CY, HW)

    # packed image (C*B, HW): row index c*B + b
    img = jnp.transpose(jnp.asarray(image_init, jnp.float32),
                        (1, 0, 2, 3)).reshape(CB, HW)

    vmem = pl.BlockSpec(memory_space=pltpu.MemorySpace.VMEM)

    if sample_from_prior:
        # prior trajectory is affine in the initial image -> one matmul
        Pt = np.eye(CB)
        pt = np.zeros((CB, 1))
        for k in range(T):
            pt = Pk[k].astype(np.float64) @ pt + pb[k].astype(np.float64)
            Pt = Pk[k].astype(np.float64) @ Pt
        out = pl.pallas_call(
            _affine_kernel,
            out_shape=jax.ShapeDtypeStruct((CB, HW), jnp.float32),
            in_specs=[vmem] * 3,
            out_specs=vmem,
        )(img, jnp.asarray(Pt, jnp.float32), jnp.asarray(pt, jnp.float32))
        return jnp.transpose(out.reshape(C, B, H, W), (1, 0, 2, 3))

    # classifier weight, single lane-dense copy: wcls2[c*Y+y, i] = Wcls[y, c*HW+i]
    wcls2 = np.transpose(Wcls3, (1, 0, 2)).reshape(CY, HW).astype(f32)
    meas = np.broadcast_to(np.asarray(measurement, f32).reshape(1, Y),
                           (B, Y)).copy()
    mask = np.kron(np.eye(C, dtype=f32), np.ones((B, Y), dtype=f32))  # (CB, CY)

    kernel = _make_posterior_kernel(T, B, C, Y)
    out = pl.pallas_call(
        kernel,
        out_shape=jax.ShapeDtypeStruct((CB, HW), jnp.float32),
        in_specs=[vmem] * 9,
        out_specs=vmem,
    )(img, jnp.asarray(meas), jnp.asarray(mask), jnp.asarray(wcls2),
      jnp.asarray(Ak), jnp.asarray(ab), jnp.asarray(Pk), jnp.asarray(pb),
      jnp.asarray(Vk))

    # back to NCHW
    return jnp.transpose(out.reshape(C, B, H, W), (1, 0, 2, 3))


# TODO(synk): the mc=True Monte-Carlo particle guidance path (per-particle
# perturbations + logsumexp of norms) and HF hub push/save/load are not
# translated.

if __name__ == "__main__":
    B, C, H, W = 2, 4, 16, 16       # batch, in_channels, sample_size
    Y = 8                           # y_dim
    T = 8                           # sampling_length

    key = jax.random.PRNGKey(0)
    k1, k2, k3, k4, k5 = jax.random.split(key, 5)
    image_init = jax.random.normal(k1, (B, C, H, W), dtype=jnp.float32)
    weps = 0.05 * jax.random.normal(k2, (C, C), dtype=jnp.float32)
    beps = 0.05 * jax.random.normal(k3, (C,), dtype=jnp.float32)
    wcls = 0.02 * jax.random.normal(k4, (Y, C * H * W), dtype=jnp.float32)
    measurement = jnp.zeros((Y,), jnp.float32).at[0].set(1.0)   # finetune_class=(0,)
    measurement_noise = jax.random.normal(k5, (Y,), dtype=jnp.float32)

    out = posterior_prior_baseline_sample(
        image_init, weps, beps, wcls, measurement, measurement_noise,
        traj_length=1000, sampling_length=T, scale=1.0,
        sample_from_prior=False)
    out = jax.block_until_ready(out)

    assert out.shape == (B, C, H, W), out.shape
    assert bool(jnp.all(jnp.isfinite(out)))
    print("KERNEL_OK")
</pallas_src>

<mosaic_0001>
module attributes {stable_mosaic.version = 11 : i64} {
  func.func @kernel(%arg0: memref<8x256xf32, #tpu.memory_space<vmem>>, %arg1: memref<2x8xf32, #tpu.memory_space<vmem>>, %arg2: memref<8x32xf32, #tpu.memory_space<vmem>>, %arg3: memref<32x256xf32, #tpu.memory_space<vmem>>, %arg4: memref<8x8x8xf32, #tpu.memory_space<vmem>>, %arg5: memref<8x8x1xf32, #tpu.memory_space<vmem>>, %arg6: memref<8x8x8xf32, #tpu.memory_space<vmem>>, %arg7: memref<8x8x1xf32, #tpu.memory_space<vmem>>, %arg8: memref<8x32x256xf32, #tpu.memory_space<vmem>>, %arg9: memref<8x256xf32, #tpu.memory_space<vmem>>) attributes {dimension_semantics = [], scalar_prefetch = 0 : i64, scratch_operands = 0 : i64, tpu.core_type = #tpu.core_type<tc>} {
    %c0 = arith.constant 0 : index
    %c0_0 = arith.constant 0 : index
    %0 = vector.load %arg1[%c0, %c0_0] : memref<2x8xf32, #tpu.memory_space<vmem>>, vector<2x8xf32>
    %c0_1 = arith.constant 0 : index
    %c0_2 = arith.constant 0 : index
    %1 = vector.load %arg2[%c0_1, %c0_2] : memref<8x32xf32, #tpu.memory_space<vmem>>, vector<8x32xf32>
    %c0_3 = arith.constant 0 : index
    %c0_4 = arith.constant 0 : index
    %2 = vector.load %arg0[%c0_3, %c0_4] : memref<8x256xf32, #tpu.memory_space<vmem>>, vector<8x256xf32>
    %c0_i32 = arith.constant 0 : i32
    %c8_i32 = arith.constant 8 : i32
    %3 = arith.addi %c0_i32, %c8_i32 : i32
    %c1_i32 = arith.constant 1 : i32
    %4 = scf.for %arg10 = %c0_i32 to %3 step %c1_i32 iter_args(%arg11 = %2) -> (vector<8x256xf32>)  : i32 {
      %6 = arith.index_cast %arg10 : i32 to index
      %c0_8 = arith.constant 0 : index
      %c0_9 = arith.constant 0 : index
      %7 = vector.load %arg4[%6, %c0_8, %c0_9] : memref<8x8x8xf32, #tpu.memory_space<vmem>>, vector<1x8x8xf32>
      %8 = vector.shape_cast %7 : vector<1x8x8xf32> to vector<8x8xf32>
      %9 = arith.index_cast %arg10 : i32 to index
      %c0_10 = arith.constant 0 : index
      %c0_11 = arith.constant 0 : index
      %10 = vector.load %arg5[%9, %c0_10, %c0_11] : memref<8x8x1xf32, #tpu.memory_space<vmem>>, vector<1x8x1xf32>
      %11 = vector.shape_cast %10 : vector<1x8x1xf32> to vector<8x1xf32>
      %12 = arith.index_cast %arg10 : i32 to index
      %c0_12 = arith.constant 0 : index
      %c0_13 = arith.constant 0 : index
      %13 = vector.load %arg6[%12, %c0_12, %c0_13] : memref<8x8x8xf32, #tpu.memory_space<vmem>>, vector<1x8x8xf32>
      %14 = vector.shape_cast %13 : vector<1x8x8xf32> to vector<8x8xf32>
      %15 = arith.index_cast %arg10 : i32 to index
      %c0_14 = arith.constant 0 : index
      %c0_15 = arith.constant 0 : index
      %16 = vector.load %arg7[%15, %c0_14, %c0_15] : memref<8x8x1xf32, #tpu.memory_space<vmem>>, vector<1x8x1xf32>
      %17 = vector.shape_cast %16 : vector<1x8x1xf32> to vector<8x1xf32>
      %cst = arith.constant dense<0.000000e+00> : vector<8x256xf32>
      %18 = tpu.matmul %8, %arg11, %cst {dimension_numbers = #tpu.dot_dimension_numbers<[1], [0], [0], [1], [0, 0, 1, 1], [], []>} : vector<8x8xf32>, vector<8x256xf32>, vector<8x256xf32> -> vector<8x256xf32>
      %19 = vector.broadcast %11 : vector<8x1xf32> to vector<8x256xf32>
      %20 = arith.addf %18, %19 : vector<8x256xf32>
      %cst_16 = arith.constant dense<0.000000e+00> : vector<8x256xf32>
      %21 = tpu.matmul %14, %arg11, %cst_16 {dimension_numbers = #tpu.dot_dimension_numbers<[1], [0], [0], [1], [0, 0, 1, 1], [], []>} : vector<8x8xf32>, vector<8x256xf32>, vector<8x256xf32> -> vector<8x256xf32>
      %22 = vector.broadcast %17 : vector<8x1xf32> to vector<8x256xf32>
      %23 = arith.addf %21, %22 : vector<8x256xf32>
      %c0_17 = arith.constant 0 : index
      %c0_18 = arith.constant 0 : index
      %24 = vector.load %arg3[%c0_17, %c0_18] : memref<32x256xf32, #tpu.memory_space<vmem>>, vector<32x256xf32>
      %cst_19 = arith.constant dense<0.000000e+00> : vector<8x32xf32>
      %25 = tpu.matmul %20, %24, %cst_19 {dimension_numbers = #tpu.dot_dimension_numbers<[1], [1], [0], [0], [0, 0, 1, 0], [], []>} : vector<8x256xf32>, vector<32x256xf32>, vector<8x32xf32> -> vector<8x32xf32>
      %26 = vector.extract_strided_slice %25 {offsets = [0, 0], sizes = [2, 8], strides = [1, 1]} : vector<8x32xf32> to vector<2x8xf32>
      %27 = vector.extract_strided_slice %25 {offsets = [2, 8], sizes = [2, 8], strides = [1, 1]} : vector<8x32xf32> to vector<2x8xf32>
      %28 = arith.addf %26, %27 : vector<2x8xf32>
      %29 = vector.extract_strided_slice %25 {offsets = [4, 16], sizes = [2, 8], strides = [1, 1]} : vector<8x32xf32> to vector<2x8xf32>
      %30 = arith.addf %28, %29 : vector<2x8xf32>
      %31 = vector.extract_strided_slice %25 {offsets = [6, 24], sizes = [2, 8], strides = [1, 1]} : vector<8x32xf32> to vector<2x8xf32>
      %32 = arith.addf %30, %31 : vector<2x8xf32>
      %33 = arith.subf %0, %32 : vector<2x8xf32>
      %34 = arith.mulf %33, %33 : vector<2x8xf32>
      %35 = vector.shape_cast %34 : vector<2x8xf32> to vector<1x2x8xf32>
      %cst_20 = arith.constant dense<0.000000e+00> : vector<1xf32>
      %36 = vector.multi_reduction <add>, %35, %cst_20 [1, 2] : vector<1x2x8xf32> to vector<1xf32>
      %37 = vector.shape_cast %36 : vector<1xf32> to vector<1x1x1xf32>
      %38 = vector.extract %37[0, 0, 0] : f32 from vector<1x1x1xf32>
      %cst_21 = arith.constant 9.99999968E-21 : f32
      %39 = arith.maximumf %38, %cst_21 : f32
      %40 = math.rsqrt %39 : f32
      %41 = vector.broadcast %40 : f32 to vector<2x8xf32>
      %42 = arith.mulf %41, %33 : vector<2x8xf32>
      %43 = tpu.concatenate %42, %42, %42, %42 in 1 : vector<2x8xf32>, vector<2x8xf32>, vector<2x8xf32>, vector<2x8xf32> -> vector<2x32xf32>
      %44 = tpu.concatenate %43, %43, %43, %43 in 0 : vector<2x32xf32>, vector<2x32xf32>, vector<2x32xf32>, vector<2x32xf32> -> vector<8x32xf32>
      %45 = arith.mulf %44, %1 : vector<8x32xf32>
      %46 = arith.index_cast %arg10 : i32 to index
      %c0_22 = arith.constant 0 : index
      %c0_23 = arith.constant 0 : index
      %47 = vector.load %arg8[%46, %c0_22, %c0_23] : memref<8x32x256xf32, #tpu.memory_space<vmem>>, vector<1x32x256xf32>
      %48 = vector.shape_cast %47 : vector<1x32x256xf32> to vector<32x256xf32>
      %cst_24 = arith.constant dense<0.000000e+00> : vector<8x256xf32>
      %49 = tpu.matmul %45, %48, %cst_24 {dimension_numbers = #tpu.dot_dimension_numbers<[1], [0], [0], [1], [0, 0, 1, 1], [], []>} : vector<8x32xf32>, vector<32x256xf32>, vector<8x256xf32> -> vector<8x256xf32>
      %50 = arith.addf %23, %49 : vector<8x256xf32>
      scf.yield %50 : vector<8x256xf32>
    }
    %c8_i32_5 = arith.constant 8 : i32
    %c0_6 = arith.constant 0 : index
    %c0_7 = arith.constant 0 : index
    %5 = vector.load %arg9[%c0_6, %c0_7] : memref<8x256xf32, #tpu.memory_space<vmem>>, vector<8x256xf32>
    tpu.vector_store %arg9[%c0_6, %c0_7], %4 {strides = array<i32>} : memref<8x256xf32, #tpu.memory_space<vmem>>, vector<8x256xf32>,
    return
  }
}

</mosaic_0001>

<bundles_post_ra>
// kernel: tpu_custom_call.1
= control target key start
LH: loop header
LB: loop body
LE: loop exit
PB: predicated region body
PF: predicated region fallthrough
CT: control target
= control target key end

     0   :  { %14 = vsyncpa [#allocation3], 0  ;;  %s881_s0 = inlined_call_operand.vmem [shape: f32[8,256], index: 0, kind: input, shape index: {}]   ;;  %s882_s1 = inlined_call_operand.hbm [shape: f32[2,8], index: 1, kind: input, shape index: {}]   ;;  %s883_s2 = inlined_call_operand.hbm [shape: f32[8,32], index: 2, kind: input, shape index: {}]   ;;  %s884_s3 = inlined_call_operand.vmem [shape: f32[32,256], index: 3, kind: input, shape index: {}]   ;;  %s885_s4 = inlined_call_operand.vmem [shape: f32[8,8,8], index: 4, kind: input, shape index: {}]   ;;  %s886_s5 = inlined_call_operand.vmem [shape: f32[8,8,1], index: 5, kind: input, shape index: {}]   ;;  %s887_s6 = inlined_call_operand.hbm [shape: f32[8,8,8], index: 6, kind: input, shape index: {}]   ;;  %s888_s7 = inlined_call_operand.vmem [shape: f32[8,8,1], index: 7, kind: input, shape index: {}]   ;;  %s889_s8 = inlined_call_operand.hbm [shape: f32[8,32,256], index: 8, kind: input, shape index: {}]   ;;  %s890_s9 = inlined_call_operand.hbm [shape: f32[8,256], index: 9, kind: output, shape index: {}]  }
   0x1   :  { %15 = vsyncpa [#allocation6], 0 }
   0x2   :  { %16 = vsyncpa [#allocation9], 0 }
   0x3   :  { %17 = vsyncpa [#allocation4], 0  ;;  %s721_s30 = smov [#allocation5]   ;;  %s722_s11 = smov [#allocation2]  }
   0x4   :  { %s36_s10 = sshll.u32 %s721_s30, 4  ;;  %s26_s12 = sshll.u32 %s722_s11, 4  ;;  %s37_s10 = int_to_ptr.vmem [resolvable:$true] %s36_s10  ;;  %s27_s12 = int_to_ptr.vmem [resolvable:$true] %s26_s12 }
   0x5   :  { %s597_s13 = scalar_lea.vmem %s37_s10, 128  ;;  %p602_p1 = scmp.lt.s32.totalorder %s37_s10, %s37_s10 }
   0x6   :  { %p598_p0 = scmp.ne.s32.totalorder %s37_s10, %s597_s13  ;;  %p603_p2 = scmp.lt.s32.totalorder %s597_s13, %s597_s13 }
   0x8   :  { %p604_p3 = por %p603_p2, %p602_p1 }
   0xa   :  { %p605_p4 = pnand %p604_p3, %p598_p0 }
   0xc   :  { %608 = shalt.err (!%p605_p4)
}
   0xd   :  { %39 = dma.hbm_to_vmem [thread:$0]  %s883_s2, 128, %s37_s10, [#allocation6]  }
   0xe   :  { %s617_s16 = scalar_lea.vmem %s27_s12, 32  ;;  %p622_p6 = scmp.lt.s32.totalorder %s27_s12, %s27_s12 }
   0xf   :  { %p618_p5 = scmp.ne.s32.totalorder %s27_s12, %s617_s16  ;;  %p623_p7 = scmp.lt.s32.totalorder %s617_s16, %s617_s16 }
  0x11   :  { %p624_p8 = por %p623_p7, %p622_p6 }
  0x13   :  { %p625_p9 = pnand %p624_p8, %p618_p5 }
  0x15   :  { %628 = shalt.err (!%p625_p9)
}
  0x16   :  { %29 = dma.hbm_to_vmem [thread:$0]  %s882_s1, 32, %s27_s12, [#allocation3]  }
  0x17   :  { %s723_s19 = smov [#allocation7]  }
  0x18   :  { %s51_s20 = sshll.u32 %s723_s19, 4  ;;  %s52_s20 = int_to_ptr.vmem [resolvable:$true] %s51_s20 }
  0x19   :  { %s637_s21 = scalar_lea.vmem %s52_s20, 1024  ;;  %p642_p11 = scmp.lt.s32.totalorder %s52_s20, %s52_s20 }
  0x1a   :  { %p638_p10 = scmp.ne.s32.totalorder %s52_s20, %s637_s21  ;;  %p643_p12 = scmp.lt.s32.totalorder %s637_s21, %s637_s21 }
  0x1c   :  { %p644_p13 = por %p643_p12, %p642_p11 }
  0x1e   :  { %p645_p0 = pnand %p644_p13, %p638_p10 }
  0x20   :  { %648 = shalt.err (!%p645_p0)
}
  0x21   :  { %s724_s2 = smov 128   ;;  %s725_s22 = smov 8  }
  0x22   :  { %57 = dma.hbm_to_vmem [thread:$0]  %s887_s6, 1024, %s52_s20, [#allocation6], %s724_s2, %s724_s2, %s725_s22  }
  0x23   :  { %s726_s25 = smov [#allocation8]  }
  0x24   :  { %s65_s26 = sshll.u32 %s726_s25, 4  ;;  %s66_s26 = int_to_ptr.vmem [resolvable:$true] %s65_s26 }
  0x25   :  { %s657_s1 = scalar_lea.vmem %s66_s26, 8192  ;;  %p662_p2 = scmp.lt.s32.totalorder %s66_s26, %s66_s26 }
  0x26   :  { %p658_p1 = scmp.ne.s32.totalorder %s66_s26, %s657_s1  ;;  %p663_p3 = scmp.lt.s32.totalorder %s657_s1, %s657_s1 }
  0x28   :  { %p664_p4 = por %p663_p3, %p662_p2 }
  0x2a   :  { %p665_p5 = pnand %p664_p4, %p658_p1 }
  0x2c   :  { %668 = shalt.err (!%p665_p5)
}
  0x2d   :  { %s727_s27 = smov 256   ;;  %s728_s28 = smov 16  }
  0x2e   :  { %71 = dma.hbm_to_vmem [thread:$0]  %s889_s8, 8192, %s66_s26, [#allocation9], %s727_s27, %s727_s27, %s728_s28  }
  0x2f   :  { %701 = dma.done.wait [#allocation3], 32  }
  0x30   :  { %702 = vsyncadd [#allocation3], 4294967264 }
  0x31   :  { %703 = dma.done.wait [#allocation6], 1152  }
  0x32   :  { %704 = vsyncadd [#allocation6], 4294966144 }
  0x33   :  { %705 = dma.done.wait [#allocation9], 8192  }
  0x34   :  { %706 = vsyncadd [#allocation9], 4294959104  ;;  %v801_v0 = vld [vmem:[#allocation2] sm:$0x3]  ;;  %v803_v1 = vld [vmem:[#allocation5] sm:$0xff]  ;;  %s815_s8 = smov 0  }
  0x35   :  { %v86_v2 = vld [vmem:[%s881_s0] sm:$0xff]   ;;  %v87_v3 = vld [vmem:[%s881_s0 + $0x8] sm:$0xff]  }
  0x36 LB: > { %v271_v4 = vld [vmem:[%s884_s3 + $0x38] sm:$0xff]  ;;  %v270_v5 = vld [vmem:[%s884_s3 + $0x30] sm:$0xff]  ;;  %v729_v6 = vmov 0.0   ;;  %v269_v7 = vld [vmem:[%s884_s3 + $0x28] sm:$0xff]  ;;  %144 = vmatprep.subr.mxu1 %v711_v3  ;;  %s833_s18 = sshll.u32 %s719_s8, 3  ;;  %vm110_vm0 = vcmask 64512   ;;  %s719_s8 = sphi %s815_s8, %s93_s8   ;;  %v715_v2 = vphi %v86_v2, %v892_v2   ;;  %v711_v3 = vphi %v87_v3, %v891_v3  }
  0x37   : > { %178 = vmatprep.mubr.f32.mxu1 %v729_v6  ;;  %296 = vmatprep.subr.mxu0 %v271_v4  ;;  %v730_v8 = vmov 0   ;;  %s97_s21 = scalar_lea.vmem %s885_s4, %s833_s18  ;;  %s99_s23 = scalar_lea.vmem %s886_s5, %s833_s18  ;;  %v268_v10 = vld [vmem:[%s884_s3 + $0x20] sm:$0xff]  ;;  %v267_v12 = vld [vmem:[%s884_s3 + $0x18] sm:$0xff]  ;;  %v266_v13 = vld [vmem:[%s884_s3 + $0x10] sm:$0xff]  ;;  %vm360_vm1 = vcmask 58368   ;;  %vm388_vm2 = vcmask 130048  }
  0x38   : > { %585 = vset.pattern.permute.xlu0 %v730_v8  ;;  %145 = vmatpush1.msra.mxu1 %v715_v2  ;;  %v98_v9 = vld [vmem:[%s97_s21] sm:$0xff]  ;;  %v265_v14 = vld [vmem:[%s884_s3 + $0x8] sm:$0xff]  ;;  %s731_s11 = smov 112   ;;  %s732_s12 = smov 120   ;;  %vm390_vm3 = vcmask 195584   ;;  %vm399_vm4 = vcmask 1041408  }
  0x39   : > { %297 = vmatpush1.xpose.msra.mxu0 %v270_v5  ;;  %223 = vmatprep.subr.mxu1 %v711_v3  ;;  %v100_v11 = vld [vmem:[%s99_s23] sm:$0xff]  ;;  %s733_s13 = smov 104   ;;  %s734_s0 = smov 1e-20   ;;  %vm401_vm5 = vcmask 1043456   ;;  %vm403_vm6 = vcmask 1045504  }
  0x3a   : > { %298 = vmatprep.subr.mxu0 %v269_v7  ;;  %534 = vmatmul.mubr.msk.f32.vlgmr.msra.gmra.mxu1 %vm110_vm0, %v98_v9  ;;  %v264_v15 = vld [vmem:[%s884_s3] sm:$0xff]  ;;  %s538_s16 = sshll.u32 %s719_s8, 6  ;;  %s101_s17 = scalar_lea.vmem [#allocation7], %s833_s18  ;;  %vm416_vm7 = vcmask 261120  }
  0x3b   : > { %586 = vset.pattern.permute.xlu1 %v730_v8  ;;  %107 = vperm.xlu0 %585, %v100_v11   ;;  %v102_v44 = vld [vmem:[%s101_s17] sm:$0xff]  ;;  %s407_s19 = scalar_lea.vmem [#allocation8], %s538_s16  ;;  %s735_s21 = smov 8  }
  0x3c   : > { %224 = vmatpush1.msra.mxu1 %v715_v2  ;;  %257 = vmatprep.mubr.f32.mxu1 %v729_v6  ;;  %v415_v45 = vld [vmem:[%s407_s19 + $0x38] sm:$0xff]  ;;  %v414_v46 = vld [vmem:[%s407_s19 + $0x30] sm:$0xff]  ;;  %v413_v47 = vld [vmem:[%s407_s19 + $0x28] sm:$0xff]  ;;  %s736_s2 = smov 16   ;;  %s103_s24 = scalar_lea.vmem %s888_s7, %s833_s18 }
  0x3d   : > { %299 = vmatpush1.xpose.msra.mxu0 %v268_v10  ;;  %444 = vmatprep.subr.mxu1 %v415_v45  ;;  %v412_v49 = vld [vmem:[%s407_s19 + $0x20] sm:$0xff]  ;;  %v411_v51 = vld [vmem:[%s407_s19 + $0x18] sm:$0xff]  ;;  %v410_v52 = vld [vmem:[%s407_s19 + $0x10] sm:$0xff]  ;;  %s737_s25 = smov 24   ;;  %s93_s8 = sadd.s32 1, %s719_s8  }
  0x3e   : > { %300 = vmatprep.subr.mxu0 %v267_v12  ;;  %535 = vmatmul.mubr.msk.f32.vlgmr.msra.gmra.mxu1 %vm110_vm0, %v102_v44  ;;  %v409_v53 = vld [vmem:[%s407_s19 + $0x8] sm:$0xff]  ;;  %v408_v54 = vld [vmem:[%s407_s19] sm:$0xff]  ;;  %p90_p6 = scmp.ge.s32.totalorder %s93_s8, 8  }
  0x3f   : > { %484 = vmatprep.mubr.f32.mxu1 %v729_v6  ;;  %445 = vmatpush1.msra.mxu1 %v414_v46  ;;  %v104_v55 = vld [vmem:[%s103_s24] sm:$0xff]  ;;  %s738_s18 = smov (%p90_p6), [#allocation10]  }
  0x40   : > { %446 = vmatprep.subr.mxu1 %v413_v47  ;;  %s501_s26 = sshll.u32 (%p90_p6), %s738_s18, 4  ;;  %s502_s26 = int_to_ptr.vmem [resolvable:$true] %s501_s26 }
  0x41   : > { %301 = vmatpush1.xpose.msra.mxu0 %v266_v13  ;;  %447 = vmatpush1.msra.mxu1 %v412_v49  ;;  %s669_s1 = scalar_lea.vmem (%p90_p6), %s502_s26, 256  ;;  %p674_p8 = scmp.lt.s32.totalorder (%p90_p6), %s502_s26, %s502_s26 }
  0x42   : > { %302 = vmatprep.subr.mxu0 %v265_v14  ;;  %448 = vmatprep.subr.mxu1 %v411_v51  ;;  %p670_p7 = scmp.ne.s32.totalorder (%p90_p6), %s502_s26, %s669_s1  ;;  %p675_p9 = scmp.lt.s32.totalorder (%p90_p6), %s669_s1, %s669_s1 }
  0x43   : > { %449 = vmatpush1.msra.mxu1 %v410_v52 }
  0x44   : > { %450 = vmatprep.subr.mxu1 %v409_v53  ;;  %p676_p10 = por (%p90_p6), %p675_p9, %p674_p8 }
  0x45   : > { %303 = vmatpush1.xpose.msra.mxu0 %v264_v15  ;;  %451 = vmatpush1.msra.mxu1 %v408_v54 }
  0x46   :  { %p677_p11 = pnand (%p90_p6), %p676_p10, %p670_p7 }
  0xb6   : > { %v108_v17 = vpop.permute.xlu0 %107 }
  0xfa   : > { %v180_v16 = vpop.f32.mrf.mxu1 }
  0xfb   : > { %v181_v20 = vadd.f32 %v180_v16, %v108_v17 }
  0xfc   : > { %v182_v18 = vpop.f32.mrf.mxu1 }
  0xfd   : > { %v183_v19 = vadd.f32 %v182_v18, %v108_v17 }
  0xfe   : > { %v259_v7 = vpop.f32.mrf.mxu1 }
  0xff   : > { %336 = vmatprep.mubr.f32.mxu0 %v183_v19 }
 0x100   : > { %337 = vmatmul.mubr.f32.vlgmr.msra.gmra.mxu0 %v181_v20  ;;  %v261_v9 = vpop.f32.mrf.mxu1 }
 0x1c0   : > { %v338_v21 = vpop.f32.mrf.mxu0 }
 0x1c1   : > { %v348_v22 = vrot.slane %v338_v21, 4  ;;  %v343_v23 = vrot.slane %v338_v21, 2  ;;  %v353_v25 = vrot.slane %v338_v21, 6 }
 0x1c2   : > { %v340_v24 = vpop.f32.mrf.mxu0 }
 0x1c3   : > { %349 = vrot.lane.b32.xlu1 %v348_v22, %s731_s11  ;;  %344 = vrot.lane.b32.xlu0 %v343_v23, %s732_s12 }
 0x1c7   : > { %354 = vrot.lane.b32.xlu1 %v353_v25, %s733_s13 }
 0x235   : > { %v350_v26 = vpop.permute.xlu1 %349  ;;  %v345_v27 = vpop.permute.xlu0 %344 }
 0x236   : > { %v347_v28 = vadd.f32 %v345_v27, %v338_v21 }
 0x238   : > { %v352_v29 = vadd.f32 %v350_v26, %v347_v28 }
 0x239   : > { %v355_v30 = vpop.permute.xlu1 %354 }
 0x23a   : > { %v357_v31 = vadd.f32 %v355_v30, %v352_v29 }
 0x23c   : > { %v358_v32 = vsub.f32 %v801_v0, %v357_v31 }
 0x23e   : > { %v359_v33 = vmul.f32 %v358_v32, %v358_v32 }
 0x240   : > { %v361_v34 = vsel %vm360_vm1, %v359_v33, 0.0 }
 0x241   : > { %362 = vadd.xlane.f32.xlu0 %v361_v34 }
 0x2ca   : > { %v363_v35 = vpop.xlane.xlu0 %362 }
 0x2cb   : > { %v364_v36 = vrot.slane %v363_v35, 4 }
 0x2cd   : > { %v365_v37 = vadd.f32 %v364_v36, %v363_v35 }
 0x2cf   : > { %v366_v38 = vrot.slane %v365_v37, 2 }
 0x2d1   : > { %v367_v39 = vadd.f32 %v366_v38, %v365_v37 }
 0x2d3   : > { %v368_v40 = vrot.slane %v367_v39, 1 }
 0x2d5   : > { %v369_v41 = vadd.f32 %v368_v40, %v367_v39 }
 0x2d7   : > { %539 = vpush %v369_v41 }
 0x308   : > { %s540_s14 = spop %539 }
 0x309   : > { %s371_s15 = smax.f32 %s734_s0, %s540_s14 }
 0x30a   : > { %v372_v42 = vstv %s371_s15 }
 0x30b   : > { %587 = vrsqrt.f32 %v372_v42 }
 0x318   : > { %v588_v43 = vpop.eup %587 }
 0x319   : > { %541 = vpush %v588_v43 }
 0x34a   : > { %s542_s20 = spop %541 }
 0x34b   : > { %v375_v48 = vstv %s542_s20 }
 0x34c   : > { %v376_v50 = vmul.f32 %v375_v48, %v358_v32 }
 0x34e   : > { %378 = vrot.lane.b32.xlu1 %v376_v50, %s735_s21 }
 0x352   : > { %381 = vrot.lane.b32.xlu1 %v376_v50, %s736_s2 }
 0x356   : > { %384 = vrot.lane.b32.xlu1 %v376_v50, %s737_s25 }
 0x35a   : > { %187 = vperm.xlu1 %586, %v104_v55  }
 0x3c0   : > { %v379_v56 = vpop.permute.xlu1 %378 }
 0x3c1   : > { %v387_v58 = vsel %vm110_vm0, %v376_v50, %v379_v56 }
 0x3c4   : > { %v382_v57 = vpop.permute.xlu1 %381 }
 0x3c5   : > { %v389_v59 = vsel %vm388_vm2, %v387_v58, %v382_v57 }
 0x3c8   : > { %v385_v60 = vpop.permute.xlu1 %384 }
 0x3c9   : > { %v391_v61 = vsel %vm390_vm3, %v389_v59, %v385_v60 }
 0x3ca   : > { %v393_v62 = vrot.slane %v391_v61, 6  ;;  %v395_v63 = vrot.slane %v391_v61, 4  ;;  %v397_v2 = vrot.slane %v391_v61, 2 }
 0x3cc   : > { %v400_v3 = vsel %vm399_vm4, %v391_v61, %v393_v62 }
 0x3cd   : > { %v402_v4 = vsel %vm401_vm5, %v400_v3, %v395_v63 }
 0x3ce   : > { %v404_v5 = vsel %vm403_vm6, %v402_v4, %v397_v2 }
 0x3cf   : > { %v405_v6 = vmul.f32 %v404_v5, %v803_v1 }
 0x3d1   : > { %537 = vmatmul.mubr.msk.f32.vlgmr.msra.gmra.mxu1 %vm416_vm7, %v405_v6 }
 0x3d5   : > { %v188_v8 = vpop.permute.xlu1 %187 }
 0x3d6   : > { %v260_v10 = vadd.f32 %v259_v7, %v188_v8  ;;  %v262_v12 = vadd.f32 %v261_v9, %v188_v8 }
 0x491   : > { %v486_v11 = vpop.f32.mrf.mxu1 }
 0x492   : > { %v491_v13 = vadd.f32 %v486_v11, %v260_v10   ;;  %92 = sbr.rel (!%p90_p6) target bundleno = 54 (0x36), region = 84 }
 0x493   : > { %v488_v14 = vpop.f32.mrf.mxu1 }
 0x494   : > { %v492_v15 = vadd.f32 %v488_v14, %v262_v12   ;;  %v892_v2 = vmov %v491_v13  ;;  %493 = vst [vmem:[#allocation10] sm:$0xff] (%p90_p6), %v491_v13 }
 0x496   : > { %v891_v3 = vmov %v492_v15  ;;  %494 = vst [vmem:[#allocation10 + $0x8] sm:$0xff] (%p90_p6), %v492_v15 }
 0x497   :  { %680 = shalt.err (!%p677_p11)
}
 0x498   :  { %504 = dma.vmem_to_hbm [thread:$0]  %s502_s26, 256, %s890_s9, [#allocation4]  }
 0x499   :  { %707 = dma.done.wait [#allocation4], 256  }
 0x49a   :  { %708 = vsyncadd [#allocation4], 4294967040 }
 0x49b   :  { %508 = vsyncpa [#allocation3], 1 }
 0x49c   :  { %509 = vsyncpa [#allocation6], 1 }
 0x49d   :  { %510 = vsyncpa [#allocation9], 1 }
 0x49e   :  { %511 = vsyncpa [#allocation4], 1 }

</bundles_post_ra>
